<compile_context>
chip_gen: v7x
topology: tpu7x:2x2x1
jax: 0.10.0
libtpu: 0.0.40
codegen_flags: <defaults>
</compile_context>

<pallas_src>
import functools

import jax
import jax.numpy as jnp
import numpy as np
from jax.experimental import pallas as pl
from jax.experimental.pallas import tpu as pltpu


def _round_up(n, m):
    return ((n + m - 1) // m) * m


# ---------------------------------------------------------------------------
# Fused encoder kernel (conv stack + fused dense heads + sampling + KL)
# ---------------------------------------------------------------------------
def _build_encoder_kernel(bb, latent, conv_dims, n_lane):
    """conv_dims: tuple of (C_in, C_out, Lpad_in, L_out) per conv layer.

    Lpad_in (= 2*L_out, even) is the per-batch segment length of the layer's
    input as laid out in VMEM (row-major: batch-major, then time)."""
    n_conv = len(conv_dims)
    C_last = conv_dims[-1][1]
    L_last = conv_dims[-1][3]

    def kernel(*refs):
        x_ref = refs[0]
        layer_refs = refs[1:1 + 2 * n_conv]                     # w0,b0,w1,b1,...
        wd_ref, bd_ref, eps_ref = refs[1 + 2 * n_conv:4 + 2 * n_conv]
        out_ref = refs[4 + 2 * n_conv]
        bufs = refs[5 + 2 * n_conv:]                            # 2 ping-pong VMEM refs

        # ---- conv stack: each layer = 3 batched matmuls over ALL rows -------
        # Conv1d(k=3, s=2, p=1):  y[b,t] = W0.x[b,2t-1] + W1.x[b,2t] + W2.x[b,2t+1]
        for i, (C_in, C_out, Lpad_in, L_out) in enumerate(conv_dims):
            src = x_ref if i == 0 else bufs[(i - 1) % 2]
            dst = bufs[i % 2]
            w_ref = layer_refs[2 * i]                           # (3*C_in, C_out) bf16
            bias = layer_refs[2 * i + 1][...]                   # (1, C_out) f32

            R = bb * L_out
            # Batched strided taps straight from the VMEM-resident buffer.
            x_even = src[pl.ds(0, R, stride=2), 0:C_in].astype(jnp.bfloat16)  # x[b,2t]
            x_odd = src[pl.ds(1, R, stride=2), 0:C_in].astype(jnp.bfloat16)   # x[b,2t+1]

            w0 = w_ref[0 * C_in:1 * C_in, :]
            w1 = w_ref[1 * C_in:2 * C_in, :]
            w2 = w_ref[2 * C_in:3 * C_in, :]

            # x[b,2t-1] contribution: shift the (x_odd @ W0) product down one
            # row (XLU roll) and zero the t==0 rows (conv padding + batch edge).
            p_prev = jnp.dot(x_odd, w0, preferred_element_type=jnp.float32)
            row = jax.lax.broadcasted_iota(jnp.int32, (R, C_out), 0)
            prev = jnp.where((row % L_out) == 0, 0.0,
                             pltpu.roll(p_prev, shift=1, axis=0))

            acc = prev
            acc = acc + jnp.dot(x_even, w1, preferred_element_type=jnp.float32)
            acc = acc + jnp.dot(x_odd, w2, preferred_element_type=jnp.float32)
            y = jnp.maximum(acc + bias, 0.0)                    # (R, C_out) f32
            dst[0:R, 0:C_out] = y

        # ---- fused z_mean | z_log_var head: L_last matmuls of (bb, C_last) --
        y_ref = bufs[(n_conv - 1) % 2]
        bd = bd_ref[...]                                        # (1, n_lane) f32
        d = jnp.zeros((bb, n_lane), jnp.float32)
        for l in range(L_last):
            rows = y_ref[pl.ds(l, bb, stride=L_last), 0:C_last].astype(jnp.bfloat16)
            d = d + jnp.dot(rows, wd_ref[l * C_last:(l + 1) * C_last, :],
                            preferred_element_type=jnp.float32)
        d = d + bd                                              # (bb, n_lane)

        mean = d[:, 0:latent]
        logvar = d[:, latent:2 * latent]
        std = jnp.exp(0.5 * logvar)                             # reused for KL
        z = mean + std * eps_ref[...]
        kl_row = -0.5 * jnp.sum(1.0 + logvar - mean * mean - std * std,
                                axis=1, keepdims=True)          # (bb, 1)

        # Single lane-dense output tile: [mean | logvar | z | kl_row | 0...].
        # Lanes >= 2*latent of `d` are exact zeros (wd/bd padded with zeros).
        out_ref[...] = d
        out_ref[:, 2 * latent:3 * latent] = z
        out_ref[:, 3 * latent:3 * latent + 1] = kl_row

    return kernel


@functools.partial(jax.jit,
                   static_argnames=("conv_dims", "latent_dim", "n_lane", "batch_tile"))
def timevae_encoder_forward(kparams, x, eps, *, conv_dims, latent_dim, n_lane,
                            batch_tile=8):
    """x: (B, seq_len, feat_dim) -> (z_mean, z_log_var, z, kl_div)."""
    B, seq_len, feat_dim = x.shape
    C0, _, Lpad0, _ = conv_dims[0]
    assert C0 == feat_dim
    dense_dim = conv_dims[-1][1] * conv_dims[-1][3]

    # Batch tile: whole batch when small; 8-aligned chunks over a parallel grid
    # axis otherwise (v7x: 2 TensorCores, 64 MiB VMEM).
    bb = B
    if B > batch_tile and batch_tile % 8 == 0 and B % batch_tile == 0:
        bb = batch_tile
    n_tiles = B // bb

    # Row-major (batch-major, then time) layout; pad odd seq_len with one zero
    # row per batch so the batched stride-2 tap reads stay aligned.
    x3 = x
    if Lpad0 != seq_len:
        x3 = jnp.pad(x3, ((0, 0), (0, Lpad0 - seq_len), (0, 0)))
    x2 = x3.reshape(B * Lpad0, feat_dim).astype(jnp.float32)

    in_arrays = [x2]
    in_specs = [pl.BlockSpec((bb * Lpad0, feat_dim), lambda i: (i, 0))]
    for li, (ci, co, _, _) in enumerate(conv_dims):
        in_arrays += [kparams["conv_w"][li], kparams["conv_b"][li]]
        in_specs += [pl.BlockSpec((3 * ci, co), lambda i: (0, 0)),
                     pl.BlockSpec((1, co), lambda i: (0, 0))]
    in_arrays += [kparams["wd"], kparams["bd"], eps]
    in_specs += [pl.BlockSpec((dense_dim, n_lane), lambda i: (0, 0)),
                 pl.BlockSpec((1, n_lane), lambda i: (0, 0)),
                 pl.BlockSpec((bb, latent_dim), lambda i: (i, 0))]

    out_shape = jax.ShapeDtypeStruct((B, n_lane), jnp.float32)
    out_specs = pl.BlockSpec((bb, n_lane), lambda i: (i, 0))

    max_rows = max(bb * lo for (_, _, _, lo) in conv_dims)
    max_cols = max(co for (_, co, _, _) in conv_dims)
    scratch_shapes = [pltpu.VMEM((max_rows, max_cols), jnp.float32),
                      pltpu.VMEM((max_rows, max_cols), jnp.float32)]

    out = pl.pallas_call(
        _build_encoder_kernel(bb, latent_dim, conv_dims, n_lane),
        grid=(n_tiles,),
        out_shape=out_shape,
        in_specs=in_specs,
        out_specs=out_specs,
        scratch_shapes=scratch_shapes,
        compiler_params=pltpu.CompilerParams(
            dimension_semantics=("parallel",)),
    )(*in_arrays)

    z_mean = out[:, 0:latent_dim]
    z_log_var = out[:, latent_dim:2 * latent_dim]
    z = out[:, 2 * latent_dim:3 * latent_dim]
    kl = jnp.sum(out[:, 3 * latent_dim])
    return z_mean, z_log_var, z, kl


# ---------------------------------------------------------------------------
# Parameters: PyTorch-layout init + one-time kernel-layout preparation
# ---------------------------------------------------------------------------
def init_params(key, seq_len, feat_dim, hidden_layer_sizes, latent_dim):
    """Deterministic PyTorch-style (uniform +/- 1/sqrt(fan_in)) init."""
    params = {"convs": []}
    keys = jax.random.split(key, 2 * len(hidden_layer_sizes) + 4)
    ki = 0
    c_in = feat_dim
    for c_out in hidden_layer_sizes:
        bound = 1.0 / float(np.sqrt(c_in * 3))
        w = jax.random.uniform(keys[ki], (c_out, c_in, 3), jnp.float32, -bound, bound)
        ki += 1
        b = jax.random.uniform(keys[ki], (c_out,), jnp.float32, -bound, bound)
        ki += 1
        params["convs"].append((w, b))
        c_in = c_out
    l_out = seq_len
    for _ in hidden_layer_sizes:
        l_out = (l_out - 1) // 2 + 1
    dense_dim = c_in * l_out
    bound = 1.0 / float(np.sqrt(dense_dim))
    params["w_mean"] = jax.random.uniform(
        keys[ki], (dense_dim, latent_dim), jnp.float32, -bound, bound); ki += 1
    params["b_mean"] = jax.random.uniform(
        keys[ki], (latent_dim,), jnp.float32, -bound, bound); ki += 1
    params["w_logvar"] = jax.random.uniform(
        keys[ki], (dense_dim, latent_dim), jnp.float32, -bound, bound); ki += 1
    params["b_logvar"] = jax.random.uniform(
        keys[ki], (latent_dim,), jnp.float32, -bound, bound); ki += 1
    return params, dense_dim


def prepare_params(params, seq_len, latent_dim):
    """One-time layout prep: tap-major bf16 conv mats, (1,N) biases, fused +
    row-permuted + lane-padded dense head."""
    kparams = {"conv_w": [], "conv_b": []}
    conv_dims = []
    L = seq_len
    c_in = params["convs"][0][0].shape[1]
    for idx, (w, b) in enumerate(params["convs"]):
        if idx > 0 and L % 2 != 0:
            # TODO(synk): odd intermediate lengths need gap-padded scratch stores.
            raise NotImplementedError("intermediate conv input length must be even")
        c_out = w.shape[0]
        L_out = (L - 1) // 2 + 1
        Lpad = 2 * L_out
        conv_dims.append((c_in, c_out, Lpad, L_out))
        # rows [k*C_in:(k+1)*C_in] = w[:, :, k].T   (tap-major)
        w_mat = jnp.transpose(w, (2, 1, 0)).reshape(3 * c_in, c_out)
        kparams["conv_w"].append(w_mat.astype(jnp.bfloat16))
        kparams["conv_b"].append(b.reshape(1, c_out).astype(jnp.float32))
        c_in, L = c_out, L_out

    C_last, L_last = c_in, L
    dense_dim = C_last * L_last
    n_lane = _round_up(3 * latent_dim + 1, 128)

    def permute(wm):
        # PyTorch Flatten of (B, C, L) is channel-major (c*L + l); the kernel
        # flattens (l*C + c) -> permute the weight rows once here.
        return (wm.reshape(C_last, L_last, latent_dim)
                  .transpose(1, 0, 2)
                  .reshape(dense_dim, latent_dim))

    wd = jnp.concatenate([permute(params["w_mean"]),
                          permute(params["w_logvar"])], axis=1)
    wd = jnp.pad(wd, ((0, 0), (0, n_lane - 2 * latent_dim))).astype(jnp.bfloat16)
    bd = jnp.concatenate([params["b_mean"], params["b_logvar"]])
    bd = jnp.pad(bd, (0, n_lane - 2 * latent_dim)).reshape(1, n_lane).astype(jnp.float32)
    kparams["wd"] = wd
    kparams["bd"] = bd
    return kparams, tuple(conv_dims), n_lane


# ---------------------------------------------------------------------------
# Pure-JAX reference (same bf16-input / f32-accumulate matmul semantics)
# ---------------------------------------------------------------------------
def reference_forward(params, x, eps):
    h = jnp.transpose(x, (0, 2, 1))                              # (B, C, L)
    for (w, b) in params["convs"]:
        h = jax.lax.conv_general_dilated(
            h.astype(jnp.bfloat16), w.astype(jnp.bfloat16),
            window_strides=(2,), padding=((1, 1),),
            dimension_numbers=("NCH", "OIH", "NCH"),
            preferred_element_type=jnp.float32)
        h = jnp.maximum(h + b[None, :, None], 0.0)
    B = h.shape[0]
    flat = h.reshape(B, -1)                                      # NCL channel-major
    z_mean = jnp.dot(flat.astype(jnp.bfloat16),
                     params["w_mean"].astype(jnp.bfloat16),
                     preferred_element_type=jnp.float32) + params["b_mean"]
    z_log_var = jnp.dot(flat.astype(jnp.bfloat16),
                        params["w_logvar"].astype(jnp.bfloat16),
                        preferred_element_type=jnp.float32) + params["b_logvar"]
    z = z_mean + jnp.exp(0.5 * z_log_var) * eps
    kl = -0.5 * jnp.sum(1.0 + z_log_var - z_mean ** 2 - jnp.exp(z_log_var))
    return z_mean, z_log_var, z, kl


if __name__ == "__main__":
    B, seq_len, feat_dim = 2, 16, 8
    hidden_layer_sizes = (16, 32)
    latent_dim = 8

    key = jax.random.PRNGKey(0)
    kx, keps, kp = jax.random.split(key, 3)
    x = jax.random.normal(kx, (B, seq_len, feat_dim), jnp.float32)
    # torch.randn epsilon replaced by a deterministic input tensor.
    eps = jax.random.normal(keps, (B, latent_dim), jnp.float32)

    params, dense_dim = init_params(kp, seq_len, feat_dim, hidden_layer_sizes, latent_dim)
    kparams, conv_dims, n_lane = prepare_params(params, seq_len, latent_dim)

    z_mean, z_log_var, z, kl = timevae_encoder_forward(
        kparams, x, eps, conv_dims=conv_dims, latent_dim=latent_dim, n_lane=n_lane)
    jax.block_until_ready((z_mean, z_log_var, z, kl))

    ref = reference_forward(params, x, eps)
    for got, want in zip((z_mean, z_log_var, z, kl), ref):
        np.testing.assert_allclose(np.asarray(got), np.asarray(want),
                                   rtol=2e-3, atol=2e-3)

    assert z_mean.shape == (B, latent_dim)
    assert z_log_var.shape == (B, latent_dim)
    assert z.shape == (B, latent_dim)
    print("KERNEL_OK")
</pallas_src>

<mosaic_0001>
module attributes {stable_mosaic.version = 11 : i64} {
  func.func @kernel(%arg0: i32, %arg1: memref<32x8xf32, #tpu.memory_space<vmem>>, %arg2: memref<24x16xbf16, #tpu.memory_space<vmem>>, %arg3: memref<1x16xf32, #tpu.memory_space<vmem>>, %arg4: memref<48x32xbf16, #tpu.memory_space<vmem>>, %arg5: memref<1x32xf32, #tpu.memory_space<vmem>>, %arg6: memref<128x128xbf16, #tpu.memory_space<vmem>>, %arg7: memref<1x128xf32, #tpu.memory_space<vmem>>, %arg8: memref<2x8xf32, #tpu.memory_space<vmem>>, %arg9: memref<2x128xf32, #tpu.memory_space<vmem>>, %arg10: memref<16x32xf32, #tpu.memory_space<vmem>>, %arg11: memref<16x32xf32, #tpu.memory_space<vmem>>) attributes {dimension_semantics = [#tpu.dimension_semantics<parallel>], iteration_bounds = array<i64: 1>, scalar_prefetch = 0 : i64, scratch_operands = 2 : i64, tpu.core_type = #tpu.core_type<tc>, window_params = [{transform_indices = @transform_0, window_bounds = array<i64: 32, 8>}, {pipeline_mode = #tpu.pipeline_mode<synchronous>, transform_indices = @transform_1, window_bounds = array<i64: 24, 16>}, {pipeline_mode = #tpu.pipeline_mode<synchronous>, transform_indices = @transform_2, window_bounds = array<i64: 1, 16>}, {pipeline_mode = #tpu.pipeline_mode<synchronous>, transform_indices = @transform_3, window_bounds = array<i64: 48, 32>}, {pipeline_mode = #tpu.pipeline_mode<synchronous>, transform_indices = @transform_4, window_bounds = array<i64: 1, 32>}, {pipeline_mode = #tpu.pipeline_mode<synchronous>, transform_indices = @transform_5, window_bounds = array<i64: 128, 128>}, {pipeline_mode = #tpu.pipeline_mode<synchronous>, transform_indices = @transform_6, window_bounds = array<i64: 1, 128>}, {transform_indices = @transform_7, window_bounds = array<i64: 2, 8>}, {transform_indices = @transform_8, window_bounds = array<i64: 2, 128>}]} {
    %c0 = arith.constant 0 : index
    %c0_0 = arith.constant 0 : index
    %0 = vector.load %arg3[%c0, %c0_0] : memref<1x16xf32, #tpu.memory_space<vmem>>, vector<1x16xf32>
    %c0_1 = arith.constant 0 : index
    %c0_2 = arith.constant 0 : index
    %1 = tpu.strided_load %arg1[%c0_1, %c0_2] {strides = array<i32: 2, 1>} : memref<32x8xf32, #tpu.memory_space<vmem>>, vector<16x8xf32>
    %2 = arith.truncf %1 : vector<16x8xf32> to vector<16x8xbf16>
    %c1 = arith.constant 1 : index
    %c0_3 = arith.constant 0 : index
    %3 = tpu.strided_load %arg1[%c1, %c0_3] {strides = array<i32: 2, 1>} : memref<32x8xf32, #tpu.memory_space<vmem>>, vector<16x8xf32>
    %4 = arith.truncf %3 : vector<16x8xf32> to vector<16x8xbf16>
    %c0_4 = arith.constant 0 : index
    %c0_5 = arith.constant 0 : index
    %5 = vector.load %arg2[%c0_4, %c0_5] : memref<24x16xbf16, #tpu.memory_space<vmem>>, vector<8x16xbf16>
    %c8 = arith.constant 8 : index
    %c0_6 = arith.constant 0 : index
    %6 = vector.load %arg2[%c8, %c0_6] : memref<24x16xbf16, #tpu.memory_space<vmem>>, vector<8x16xbf16>
    %c16 = arith.constant 16 : index
    %c0_7 = arith.constant 0 : index
    %7 = vector.load %arg2[%c16, %c0_7] : memref<24x16xbf16, #tpu.memory_space<vmem>>, vector<8x16xbf16>
    %cst = arith.constant dense<0.000000e+00> : vector<16x16xf32>
    %8 = tpu.matmul %4, %5, %cst {dimension_numbers = #tpu.dot_dimension_numbers<[1], [0], [0], [1], [0, 0, 1, 1], [], []>} : vector<16x8xbf16>, vector<8x16xbf16>, vector<16x16xf32> -> vector<16x16xf32>
    %9 = tpu.iota {dimensions = array<i32: 0>} : vector<16x16xi32>
    %c8_i32 = arith.constant 8 : i32
    %c0_i32 = arith.constant 0 : i32
    %10 = arith.cmpi eq, %c8_i32, %c0_i32 : i32
    %c1_i32 = arith.constant 1 : i32
    %11 = arith.select %10, %c1_i32, %c8_i32 : i32
    %12 = vector.broadcast %11 : i32 to vector<16x16xi32>
    %13 = arith.remsi %9, %12 : vector<16x16xi32>
    %c0_i32_8 = arith.constant 0 : i32
    %14 = vector.broadcast %c0_i32_8 : i32 to vector<16x16xi32>
    %15 = arith.cmpi ne, %13, %14 : vector<16x16xi32>
    %c0_i32_9 = arith.constant 0 : i32
    %16 = vector.broadcast %c0_i32_9 : i32 to vector<16x16xi32>
    %17 = arith.cmpi slt, %13, %16 : vector<16x16xi32>
    %c0_i32_10 = arith.constant 0 : i32
    %18 = arith.cmpi slt, %11, %c0_i32_10 : i32
    %19 = vector.broadcast %18 : i1 to vector<16x16xi1>
    %20 = vector.broadcast %19 : vector<16x16xi1> to vector<16x16xi1>
    %21 = arith.xori %17, %20 : vector<16x16xi1>
    %22 = arith.andi %21, %15 : vector<16x16xi1>
    %23 = vector.broadcast %11 : i32 to vector<16x16xi32>
    %24 = arith.addi %13, %23 : vector<16x16xi32>
    %25 = arith.select %22, %24, %13 : vector<16x16xi1>, vector<16x16xi32>
    %c0_i32_11 = arith.constant 0 : i32
    %26 = vector.broadcast %c0_i32_11 : i32 to vector<16x16xi32>
    %27 = arith.cmpi eq, %25, %26 : vector<16x16xi32>
    %c1_i32_12 = arith.constant 1 : i32
    %28 = tpu.dynamic_rotate %8 by %c1_i32_12 dim 0 : vector<16x16xf32>, i32 -> vector<16x16xf32>
    %cst_13 = arith.constant 0.000000e+00 : f32
    %29 = vector.broadcast %cst_13 : f32 to vector<16x16xf32>
    %30 = arith.select %27, %29, %28 : vector<16x16xi1>, vector<16x16xf32>
    %cst_14 = arith.constant dense<0.000000e+00> : vector<16x16xf32>
    %31 = tpu.matmul %2, %6, %cst_14 {dimension_numbers = #tpu.dot_dimension_numbers<[1], [0], [0], [1], [0, 0, 1, 1], [], []>} : vector<16x8xbf16>, vector<8x16xbf16>, vector<16x16xf32> -> vector<16x16xf32>
    %32 = arith.addf %30, %31 : vector<16x16xf32>
    %cst_15 = arith.constant dense<0.000000e+00> : vector<16x16xf32>
    %33 = tpu.matmul %4, %7, %cst_15 {dimension_numbers = #tpu.dot_dimension_numbers<[1], [0], [0], [1], [0, 0, 1, 1], [], []>} : vector<16x8xbf16>, vector<8x16xbf16>, vector<16x16xf32> -> vector<16x16xf32>
    %34 = arith.addf %32, %33 : vector<16x16xf32>
    %35 = vector.broadcast %0 : vector<1x16xf32> to vector<16x16xf32>
    %36 = arith.addf %34, %35 : vector<16x16xf32>
    %cst_16 = arith.constant 0.000000e+00 : f32
    %37 = vector.broadcast %cst_16 : f32 to vector<16x16xf32>
    %38 = arith.maximumf %36, %37 : vector<16x16xf32>
    %c0_17 = arith.constant 0 : index
    %c0_18 = arith.constant 0 : index
    %39 = vector.load %arg10[%c0_17, %c0_18] : memref<16x32xf32, #tpu.memory_space<vmem>>, vector<16x16xf32>
    tpu.vector_store %arg10[%c0_17, %c0_18], %38 {strides = array<i32>} : memref<16x32xf32, #tpu.memory_space<vmem>>, vector<16x16xf32>,
    %c0_19 = arith.constant 0 : index
    %c0_20 = arith.constant 0 : index
    %40 = vector.load %arg5[%c0_19, %c0_20] : memref<1x32xf32, #tpu.memory_space<vmem>>, vector<1x32xf32>
    %c0_21 = arith.constant 0 : index
    %c0_22 = arith.constant 0 : index
    %41 = tpu.strided_load %arg10[%c0_21, %c0_22] {strides = array<i32: 2, 1>} : memref<16x32xf32, #tpu.memory_space<vmem>>, vector<8x16xf32>
    %42 = arith.truncf %41 : vector<8x16xf32> to vector<8x16xbf16>
    %c1_23 = arith.constant 1 : index
    %c0_24 = arith.constant 0 : index
    %43 = tpu.strided_load %arg10[%c1_23, %c0_24] {strides = array<i32: 2, 1>} : memref<16x32xf32, #tpu.memory_space<vmem>>, vector<8x16xf32>
    %44 = arith.truncf %43 : vector<8x16xf32> to vector<8x16xbf16>
    %c0_25 = arith.constant 0 : index
    %c0_26 = arith.constant 0 : index
    %45 = vector.load %arg4[%c0_25, %c0_26] : memref<48x32xbf16, #tpu.memory_space<vmem>>, vector<16x32xbf16>
    %c16_27 = arith.constant 16 : index
    %c0_28 = arith.constant 0 : index
    %46 = vector.load %arg4[%c16_27, %c0_28] : memref<48x32xbf16, #tpu.memory_space<vmem>>, vector<16x32xbf16>
    %c32 = arith.constant 32 : index
    %c0_29 = arith.constant 0 : index
    %47 = vector.load %arg4[%c32, %c0_29] : memref<48x32xbf16, #tpu.memory_space<vmem>>, vector<16x32xbf16>
    %cst_30 = arith.constant dense<0.000000e+00> : vector<8x32xf32>
    %48 = tpu.matmul %44, %45, %cst_30 {dimension_numbers = #tpu.dot_dimension_numbers<[1], [0], [0], [1], [0, 0, 1, 1], [], []>} : vector<8x16xbf16>, vector<16x32xbf16>, vector<8x32xf32> -> vector<8x32xf32>
    %49 = tpu.iota {dimensions = array<i32: 0>} : vector<8x32xi32>
    %c4_i32 = arith.constant 4 : i32
    %c0_i32_31 = arith.constant 0 : i32
    %50 = arith.cmpi eq, %c4_i32, %c0_i32_31 : i32
    %c1_i32_32 = arith.constant 1 : i32
    %51 = arith.select %50, %c1_i32_32, %c4_i32 : i32
    %52 = vector.broadcast %51 : i32 to vector<8x32xi32>
    %53 = arith.remsi %49, %52 : vector<8x32xi32>
    %c0_i32_33 = arith.constant 0 : i32
    %54 = vector.broadcast %c0_i32_33 : i32 to vector<8x32xi32>
    %55 = arith.cmpi ne, %53, %54 : vector<8x32xi32>
    %c0_i32_34 = arith.constant 0 : i32
    %56 = vector.broadcast %c0_i32_34 : i32 to vector<8x32xi32>
    %57 = arith.cmpi slt, %53, %56 : vector<8x32xi32>
    %c0_i32_35 = arith.constant 0 : i32
    %58 = arith.cmpi slt, %51, %c0_i32_35 : i32
    %59 = vector.broadcast %58 : i1 to vector<8x32xi1>
    %60 = vector.broadcast %59 : vector<8x32xi1> to vector<8x32xi1>
    %61 = arith.xori %57, %60 : vector<8x32xi1>
    %62 = arith.andi %61, %55 : vector<8x32xi1>
    %63 = vector.broadcast %51 : i32 to vector<8x32xi32>
    %64 = arith.addi %53, %63 : vector<8x32xi32>
    %65 = arith.select %62, %64, %53 : vector<8x32xi1>, vector<8x32xi32>
    %c0_i32_36 = arith.constant 0 : i32
    %66 = vector.broadcast %c0_i32_36 : i32 to vector<8x32xi32>
    %67 = arith.cmpi eq, %65, %66 : vector<8x32xi32>
    %c1_i32_37 = arith.constant 1 : i32
    %68 = tpu.dynamic_rotate %48 by %c1_i32_37 dim 0 : vector<8x32xf32>, i32 -> vector<8x32xf32>
    %cst_38 = arith.constant 0.000000e+00 : f32
    %69 = vector.broadcast %cst_38 : f32 to vector<8x32xf32>
    %70 = arith.select %67, %69, %68 : vector<8x32xi1>, vector<8x32xf32>
    %cst_39 = arith.constant dense<0.000000e+00> : vector<8x32xf32>
    %71 = tpu.matmul %42, %46, %cst_39 {dimension_numbers = #tpu.dot_dimension_numbers<[1], [0], [0], [1], [0, 0, 1, 1], [], []>} : vector<8x16xbf16>, vector<16x32xbf16>, vector<8x32xf32> -> vector<8x32xf32>
    %72 = arith.addf %70, %71 : vector<8x32xf32>
    %cst_40 = arith.constant dense<0.000000e+00> : vector<8x32xf32>
    %73 = tpu.matmul %44, %47, %cst_40 {dimension_numbers = #tpu.dot_dimension_numbers<[1], [0], [0], [1], [0, 0, 1, 1], [], []>} : vector<8x16xbf16>, vector<16x32xbf16>, vector<8x32xf32> -> vector<8x32xf32>
    %74 = arith.addf %72, %73 : vector<8x32xf32>
    %75 = vector.broadcast %40 : vector<1x32xf32> to vector<8x32xf32>
    %76 = arith.addf %74, %75 : vector<8x32xf32>
    %cst_41 = arith.constant 0.000000e+00 : f32
    %77 = vector.broadcast %cst_41 : f32 to vector<8x32xf32>
    %78 = arith.maximumf %76, %77 : vector<8x32xf32>
    %c0_42 = arith.constant 0 : index
    %c0_43 = arith.constant 0 : index
    %79 = vector.load %arg11[%c0_42, %c0_43] : memref<16x32xf32, #tpu.memory_space<vmem>>, vector<8x32xf32>
    tpu.vector_store %arg11[%c0_42, %c0_43], %78 {strides = array<i32>} : memref<16x32xf32, #tpu.memory_space<vmem>>, vector<8x32xf32>,
    %c0_44 = arith.constant 0 : index
    %c0_45 = arith.constant 0 : index
    %80 = vector.load %arg7[%c0_44, %c0_45] : memref<1x128xf32, #tpu.memory_space<vmem>>, vector<1x128xf32>
    %cst_46 = arith.constant 0.000000e+00 : f32
    %81 = vector.broadcast %cst_46 : f32 to vector<2x128xf32>
    %c0_47 = arith.constant 0 : index
    %c0_48 = arith.constant 0 : index
    %82 = tpu.strided_load %arg11[%c0_47, %c0_48] {strides = array<i32: 4, 1>} : memref<16x32xf32, #tpu.memory_space<vmem>>, vector<2x32xf32>
    %83 = arith.truncf %82 : vector<2x32xf32> to vector<2x32xbf16>
    %c0_49 = arith.constant 0 : index
    %c0_50 = arith.constant 0 : index
    %84 = vector.load %arg6[%c0_49, %c0_50] : memref<128x128xbf16, #tpu.memory_space<vmem>>, vector<32x128xbf16>
    %cst_51 = arith.constant dense<0.000000e+00> : vector<2x128xf32>
    %85 = tpu.matmul %83, %84, %cst_51 {dimension_numbers = #tpu.dot_dimension_numbers<[1], [0], [0], [1], [0, 0, 1, 1], [], []>} : vector<2x32xbf16>, vector<32x128xbf16>, vector<2x128xf32> -> vector<2x128xf32>
    %86 = arith.addf %81, %85 : vector<2x128xf32>
    %c1_52 = arith.constant 1 : index
    %c0_53 = arith.constant 0 : index
    %87 = tpu.strided_load %arg11[%c1_52, %c0_53] {strides = array<i32: 4, 1>} : memref<16x32xf32, #tpu.memory_space<vmem>>, vector<2x32xf32>
    %88 = arith.truncf %87 : vector<2x32xf32> to vector<2x32xbf16>
    %c32_54 = arith.constant 32 : index
    %c0_55 = arith.constant 0 : index
    %89 = vector.load %arg6[%c32_54, %c0_55] : memref<128x128xbf16, #tpu.memory_space<vmem>>, vector<32x128xbf16>
    %cst_56 = arith.constant dense<0.000000e+00> : vector<2x128xf32>
    %90 = tpu.matmul %88, %89, %cst_56 {dimension_numbers = #tpu.dot_dimension_numbers<[1], [0], [0], [1], [0, 0, 1, 1], [], []>} : vector<2x32xbf16>, vector<32x128xbf16>, vector<2x128xf32> -> vector<2x128xf32>
    %91 = arith.addf %86, %90 : vector<2x128xf32>
    %c2 = arith.constant 2 : index
    %c0_57 = arith.constant 0 : index
    %92 = tpu.strided_load %arg11[%c2, %c0_57] {strides = array<i32: 4, 1>} : memref<16x32xf32, #tpu.memory_space<vmem>>, vector<2x32xf32>
    %93 = arith.truncf %92 : vector<2x32xf32> to vector<2x32xbf16>
    %c64 = arith.constant 64 : index
    %c0_58 = arith.constant 0 : index
    %94 = vector.load %arg6[%c64, %c0_58] : memref<128x128xbf16, #tpu.memory_space<vmem>>, vector<32x128xbf16>
    %cst_59 = arith.constant dense<0.000000e+00> : vector<2x128xf32>
    %95 = tpu.matmul %93, %94, %cst_59 {dimension_numbers = #tpu.dot_dimension_numbers<[1], [0], [0], [1], [0, 0, 1, 1], [], []>} : vector<2x32xbf16>, vector<32x128xbf16>, vector<2x128xf32> -> vector<2x128xf32>
    %96 = arith.addf %91, %95 : vector<2x128xf32>
    %c3 = arith.constant 3 : index
    %c0_60 = arith.constant 0 : index
    %97 = tpu.strided_load %arg11[%c3, %c0_60] {strides = array<i32: 4, 1>} : memref<16x32xf32, #tpu.memory_space<vmem>>, vector<2x32xf32>
    %98 = arith.truncf %97 : vector<2x32xf32> to vector<2x32xbf16>
    %c96 = arith.constant 96 : index
    %c0_61 = arith.constant 0 : index
    %99 = vector.load %arg6[%c96, %c0_61] : memref<128x128xbf16, #tpu.memory_space<vmem>>, vector<32x128xbf16>
    %cst_62 = arith.constant dense<0.000000e+00> : vector<2x128xf32>
    %100 = tpu.matmul %98, %99, %cst_62 {dimension_numbers = #tpu.dot_dimension_numbers<[1], [0], [0], [1], [0, 0, 1, 1], [], []>} : vector<2x32xbf16>, vector<32x128xbf16>, vector<2x128xf32> -> vector<2x128xf32>
    %101 = arith.addf %96, %100 : vector<2x128xf32>
    %102 = vector.broadcast %80 : vector<1x128xf32> to vector<2x128xf32>
    %103 = arith.addf %101, %102 : vector<2x128xf32>
    %104 = vector.extract_strided_slice %103 {offsets = [0, 0], sizes = [2, 8], strides = [1, 1]} : vector<2x128xf32> to vector<2x8xf32>
    %105 = vector.extract_strided_slice %103 {offsets = [0, 8], sizes = [2, 8], strides = [1, 1]} : vector<2x128xf32> to vector<2x8xf32>
    %cst_63 = arith.constant 5.000000e-01 : f32
    %106 = vector.broadcast %cst_63 : f32 to vector<2x8xf32>
    %107 = arith.mulf %106, %105 : vector<2x8xf32>
    %108 = math.exp %107 : vector<2x8xf32>
    %c0_64 = arith.constant 0 : index
    %c0_65 = arith.constant 0 : index
    %109 = vector.load %arg8[%c0_64, %c0_65] : memref<2x8xf32, #tpu.memory_space<vmem>>, vector<2x8xf32>
    %110 = arith.mulf %108, %109 : vector<2x8xf32>
    %111 = arith.addf %104, %110 : vector<2x8xf32>
    %cst_66 = arith.constant 1.000000e+00 : f32
    %112 = vector.broadcast %cst_66 : f32 to vector<2x8xf32>
    %113 = arith.addf %112, %105 : vector<2x8xf32>
    %114 = arith.mulf %104, %104 : vector<2x8xf32>
    %115 = arith.subf %113, %114 : vector<2x8xf32>
    %116 = arith.mulf %108, %108 : vector<2x8xf32>
    %117 = arith.subf %115, %116 : vector<2x8xf32>
    %cst_67 = arith.constant dense<0.000000e+00> : vector<2xf32>
    %118 = vector.multi_reduction <add>, %117, %cst_67 [1] : vector<2x8xf32> to vector<2xf32>
    %119 = vector.shape_cast %118 : vector<2xf32> to vector<2x1xf32>
    %cst_68 = arith.constant -5.000000e-01 : f32
    %120 = vector.broadcast %cst_68 : f32 to vector<2x1xf32>
    %121 = arith.mulf %120, %119 : vector<2x1xf32>
    %c0_69 = arith.constant 0 : index
    %c0_70 = arith.constant 0 : index
    %122 = vector.load %arg9[%c0_69, %c0_70] : memref<2x128xf32, #tpu.memory_space<vmem>>, vector<2x128xf32>
    tpu.vector_store %arg9[%c0_69, %c0_70], %103 {strides = array<i32>} : memref<2x128xf32, #tpu.memory_space<vmem>>, vector<2x128xf32>,
    %c0_71 = arith.constant 0 : index
    %c16_72 = arith.constant 16 : index
    %123 = vector.load %arg9[%c0_71, %c16_72] : memref<2x128xf32, #tpu.memory_space<vmem>>, vector<2x8xf32>
    tpu.vector_store %arg9[%c0_71, %c16_72], %111 {strides = array<i32>} : memref<2x128xf32, #tpu.memory_space<vmem>>, vector<2x8xf32>,
    %c0_73 = arith.constant 0 : index
    %c24 = arith.constant 24 : index
    %124 = vector.load %arg9[%c0_73, %c24] : memref<2x128xf32, #tpu.memory_space<vmem>>, vector<2x1xf32>
    tpu.vector_store %arg9[%c0_73, %c24], %121 {strides = array<i32>} : memref<2x128xf32, #tpu.memory_space<vmem>>, vector<2x1xf32>,
    return
  }
  func.func @transform_0(%arg0: i32) -> (i32, i32) {
    %c0_i32 = arith.constant 0 : i32
    %c0_i32_0 = arith.constant 0 : i32
    return %arg0, %c0_i32 : i32, i32
  }
  func.func @transform_1(%arg0: i32) -> (i32, i32) {
    %c0_i32 = arith.constant 0 : i32
    %c0_i32_0 = arith.constant 0 : i32
    %c0_i32_1 = arith.constant 0 : i32
    return %c0_i32, %c0_i32_0 : i32, i32
  }
  func.func @transform_2(%arg0: i32) -> (i32, i32) {
    %c0_i32 = arith.constant 0 : i32
    %c0_i32_0 = arith.constant 0 : i32
    %c0_i32_1 = arith.constant 0 : i32
    return %c0_i32, %c0_i32_0 : i32, i32
  }
  func.func @transform_3(%arg0: i32) -> (i32, i32) {
    %c0_i32 = arith.constant 0 : i32
    %c0_i32_0 = arith.constant 0 : i32
    %c0_i32_1 = arith.constant 0 : i32
    return %c0_i32, %c0_i32_0 : i32, i32
  }
  func.func @transform_4(%arg0: i32) -> (i32, i32) {
    %c0_i32 = arith.constant 0 : i32
    %c0_i32_0 = arith.constant 0 : i32
    %c0_i32_1 = arith.constant 0 : i32
    return %c0_i32, %c0_i32_0 : i32, i32
  }
  func.func @transform_5(%arg0: i32) -> (i32, i32) {
    %c0_i32 = arith.constant 0 : i32
    %c0_i32_0 = arith.constant 0 : i32
    %c0_i32_1 = arith.constant 0 : i32
    return %c0_i32, %c0_i32_0 : i32, i32
  }
  func.func @transform_6(%arg0: i32) -> (i32, i32) {
    %c0_i32 = arith.constant 0 : i32
    %c0_i32_0 = arith.constant 0 : i32
    %c0_i32_1 = arith.constant 0 : i32
    return %c0_i32, %c0_i32_0 : i32, i32
  }
  func.func @transform_7(%arg0: i32) -> (i32, i32) {
    %c0_i32 = arith.constant 0 : i32
    %c0_i32_0 = arith.constant 0 : i32
    return %arg0, %c0_i32 : i32, i32
  }
  func.func @transform_8(%arg0: i32) -> (i32, i32) {
    %c0_i32 = arith.constant 0 : i32
    %c0_i32_0 = arith.constant 0 : i32
    return %arg0, %c0_i32 : i32, i32
  }
}

</mosaic_0001>

<bundles_post_ra>
// kernel: timevae_encoder_forward.1
= control target key start
LH: loop header
LB: loop body
LE: loop exit
PB: predicated region body
PF: predicated region fallthrough
CT: control target
= control target key end

     0   :  { %vm47_vm0 = vcmask 1043456   ;;  %v858_v0 = vmov 0.0   ;;  %vm859_vm1 = vmmov 0   ;;  %vm43_vm2 = vcmask 64512   ;;  %s860_s19 = smov 8   ;;  %s1036_s1 = inlined_call_operand.vmem [shape: bf16[24,16], index: 1, kind: input, shape index: {}]   ;;  %s1037_s0 = inlined_call_operand.vmem [shape: f32[32,8], index: 0, kind: input, shape index: {}]   ;;  %s1038_s3 = inlined_call_operand.vmem [shape: bf16[48,32], index: 3, kind: input, shape index: {}]   ;;  %s1039_s2 = inlined_call_operand.vmem [shape: f32[1,16], index: 2, kind: input, shape index: {}]   ;;  %s1040_s5 = inlined_call_operand.vmem [shape: bf16[128,128], index: 5, kind: input, shape index: {}]   ;;  %s1041_s4 = inlined_call_operand.vmem [shape: f32[1,32], index: 4, kind: input, shape index: {}]   ;;  %s1042_s6 = inlined_call_operand.vmem [shape: f32[1,128], index: 6, kind: input, shape index: {}]   ;;  %s1043_s8 = inlined_call_operand.vmem [shape: f32[2,128], index: 8, kind: output, shape index: {}]   ;;  %s1044_s7 = inlined_call_operand.vmem [shape: f32[2,8], index: 7, kind: input, shape index: {}]  }
   0x1   :  { %772 = vmatprep.subr.bf16.mxu0 %v858_v0  ;;  %v40_v1 = vld [vmem:[%s1036_s1] sm:$0xf]  ;;  %774 = vmatprep.mubr.msk.bf16.mxu0 %vm859_vm1, %v858_v0  ;;  %v723_v3 = vld [vmem:[%s1037_s0 + $0x11] ss:$2 sm:$0xff]  ;;  %v41_v6 = vld [vmem:[%s1036_s1 + $0x4] sm:$0xf]  ;;  %v92_v15 = vlaneseq }
   0x2   :  { %v722_v2 = vld [vmem:[%s1037_s0 + $0x1] ss:$2 sm:$0xff]  ;;  %v49_v4 = vsel %vm47_vm0, %v40_v1, 0  ;;  %778 = vmatprep.subr.bf16.mxu1 %v858_v0  ;;  %780 = vmatprep.mubr.msk.bf16.mxu1 %vm859_vm1, %v858_v0  ;;  %v132_v8 = vsel %vm47_vm0, %v41_v6, 0  ;;  %v31_v9 = vld [vmem:[%s1037_s0] ss:$2 sm:$0xff] }
   0x3   :  { %v39_v5 = vpack.c.bf16 %v723_v3, %v722_v2  ;;  %v42_v7 = vld [vmem:[%s1036_s1 + $0x8] sm:$0xf]  ;;  %773 = vmatpush3.bf16.msra.mxu0 %v49_v4  ;;  %v721_v10 = vld [vmem:[%s1037_s0 + $0x10] ss:$2 sm:$0xff]  ;;  %779 = vmatpush3.bf16.msra.mxu1 %v132_v8  ;;  %v845_v13 = vld [vmem:[%s1038_s3] sm:$0xff]   ;;  %v955_v16 = vshrl.u32 %v92_v15, 7 }
   0x4   :  { %784 = vmatprep.subr.bf16.mxu0 %v858_v0  ;;  %v178_v11 = vsel %vm47_vm0, %v42_v7, 0  ;;  %v34_v12 = vpack.c.bf16 %v721_v10, %v31_v9  ;;  %790 = vmatprep.subr.bf16.mxu1 %v858_v0  ;;  %v846_v14 = vld [vmem:[%s1038_s3 + $0x8] sm:$0xff]   ;;  %v727_v36 = vld [vmem:[%s1039_s2] ss:$0 sm:$0xff]  ;;  %vm233_vm6 = vcmask 130048   ;;  %v847_v49 = vld [vmem:[%s1038_s3 + $0x10] sm:$0xff]  }
   0x5   :  { %v94_v17 = vadd.s32 8, %v955_v16  ;;  %v99_v18 = vand.u32 7, %v955_v16  ;;  %vm123_vm3 = vcmp.lt.s32.totalorder %v955_v16, 1  ;;  %v848_v52 = vld [vmem:[%s1040_s5 + $0x10] sm:$0xff]   ;;  %v849_v53 = vld [vmem:[%s1040_s5] sm:$0xff]   ;;  %v850_v54 = vld [vmem:[%s1040_s5 + $0x18] sm:$0xff]  }
   0x6   :  { %775 = vmatmul.mubr.msk.bf16.vlgmr.msra.gmra.mrb[0].mxu0 %vm43_vm2, %v39_v5  ;;  %781 = vmatmul.mubr.msk.bf16.vlgmr.msra.gmra.mrb[0].mxu1 %vm43_vm2, %v34_v12  ;;  %v851_v55 = vld [vmem:[%s1040_s5 + $0x8] sm:$0xff]   ;;  %v301_v56 = vand.u32 3, %v955_v16  ;;  %vm417_vm8 = vcmask 261120   ;;  %vm703_vm9 = vcmask 58368   ;;  %vm713_vm10 = vcmask 189568  }
   0x7   :  { %785 = vmatpush3.bf16.msra.mxu0 %v178_v11  ;;  %786 = vmatprep.mubr.msk.bf16.mxu0 %vm859_vm1, %v858_v0  ;;  %v106_v19 = vand.u32 7, %v94_v17  ;;  %vm119_vm4 = vcmp.eq.s32.totalorder %v99_v18, 0  ;;  %vm715_vm11 = vcmask 197824  }
   0x8   :  { %796 = vmatprep.subr.bf16.mxu0 %v858_v0  ;;  %792 = vmatprep.mubr.msk.bf16.mxu1 %vm859_vm1, %v858_v0  ;;  %vm309_vm7 = vcmp.eq.s32.totalorder %v301_v56, 0 }
   0x9   :  { %791 = vmatpush3.bf16.msra.mxu1 %v845_v13  ;;  %vm120_vm5 = vcmp.eq.s32.totalorder %v106_v19, 0  ;;  %v852_v13 = vld [vmem:[%s1040_s5 + $0x20] sm:$0xff]   ;;  %v854_v19 = vld [vmem:[%s1040_s5 + $0x28] sm:$0xff]  }
   0xa   :  { %802 = vmatprep.subr.bf16.mxu1 %v858_v0 }
   0xe   :  { %787 = vmatmul.mubr.msk.bf16.vlgmr.msra.gmra.mrb[4].mxu0 %vm43_vm2, %v39_v5  ;;  %v734_v5 = vld [vmem:[%s1041_s4] ss:$0 sm:$0xff] }
   0xf   :  { %798 = vmatprep.mubr.msk.bf16.mxu0 %vm859_vm1, %v858_v0  ;;  %797 = vmatpush3.bf16.msra.mxu0 %v846_v14  ;;  %v853_v14 = vld [vmem:[%s1040_s5 + $0x30] sm:$0xff]  }
  0x10   :  { %808 = vmatprep.subr.bf16.mxu0 %v858_v0 }
  0xd9   :  { %v85_v20 = vpop.f32.mrb[0].mxu0  ;;  %v168_v22 = vpop.f32.mrb[0].mxu1 }
  0xda   :  { %v776_v21 = vpop.f32.mrb[1].mxu0  ;;  %v782_v24 = vpop.f32.mrb[1].mxu1  ;;  %v121_v25 = vrot.slane %v85_v20, 7  ;;  %v855_v20 = vld [vmem:[%s1040_s5 + $0x38] sm:$0xff]  }
  0xdb   :  { %v88_v23 = vpop.f32.mrb[2].mxu0  ;;  %v171_v28 = vpop.f32.mrb[2].mxu1 }
  0xdc   :  { %v122_v26 = vrot.slane %v88_v23, 7  ;;  %v777_v27 = vpop.f32.mrb[3].mxu0  ;;  %v783_v29 = vpop.f32.mrb[3].mxu1 }
  0xde   :  { %v125_v30 = vsel %vm123_vm3, %v122_v26, %v121_v25  ;;  %v124_v31 = vsel %vm123_vm3, %v121_v25, %v122_v26 }
  0xdf   :  { %v126_v32 = vsel %vm119_vm4, 0.0, %v125_v30  ;;  %v127_v33 = vsel %vm120_vm5, 0.0, %v124_v31 }
  0xe0   :  { %v175_v34 = vadd.f32 %v168_v22, %v126_v32  ;;  %v176_v35 = vadd.f32 %v171_v28, %v127_v33 }
  0xe1   :  { %v214_v37 = vpop.f32.mrb[4].mxu0 }
  0xe2   :  { %v221_v38 = vadd.f32 %v214_v37, %v175_v34  ;;  %v788_v39 = vpop.f32.mrb[5].mxu0 }
  0xe3   :  { %v217_v40 = vpop.f32.mrb[6].mxu0 }
  0xe4   :  { %v229_v41 = vadd.f32 %v727_v36, %v221_v38  ;;  %v222_v42 = vadd.f32 %v217_v40, %v176_v35  ;;  %v789_v43 = vpop.f32.mrb[7].mxu0  ;;  %v747_v38 = vld [vmem:[%s1042_s6] ss:$0 sm:$0xff]  ;;  %s861_s6 = smov 120  }
  0xe6   :  { %v231_v44 = vmax.f32 %v229_v41, 0.0  ;;  %v230_v45 = vadd.f32 %v727_v36, %v222_v42 }
  0xe8   :  { %234 = vst.msk [vmem:[#allocation2] sm:$0xff] %vm233_vm6, %v231_v44  ;;  %v232_v46 = vmax.f32 %v230_v45, 0.0 }
  0xea   :  { %235 = vst.msk [vmem:[#allocation2 + $0x8] sm:$0xff] %vm233_vm6, %v232_v46  ;;  %v679_v46 = vld [vmem:[%s1044_s7] sm:$0x3]  ;;  %s862_s7 = smov 16  }
  0xf1   :  { %v240_v47 = vld [vmem:[#allocation2 + $0x1] ss:$2 sm:$0xff]  ;;  %v237_v48 = vld [vmem:[#allocation2] ss:$2 sm:$0xff] }
  0xf2   :  { %v241_v50 = vpack.c.bf16 %v240_v47, %v240_v47  ;;  %v238_v51 = vpack.c.bf16 %v237_v48, %v237_v48 }
  0xf4   :  { %793 = vmatmul.mubr.msk.bf16.vlgmr.msra.gmra.mrb[4].mxu1 %vm233_vm6, %v241_v50  ;;  %799 = vmatmul.mubr.msk.bf16.vlgmr.msra.gmra.mrb[8].mxu0 %vm233_vm6, %v238_v51 }
  0xf5   :  { %803 = vmatpush3.bf16.msra.mxu1 %v847_v49  ;;  %804 = vmatprep.mubr.msk.bf16.mxu1 %vm859_vm1, %v858_v0 }
  0xf6   :  { %816 = vmatprep.subr.bf16.mxu1 %v858_v0  ;;  %812 = vmatprep.mubr.msk.bf16.mxu0 %vm859_vm1, %v858_v0 }
  0xf7   :  { %809 = vmatpush3.bf16.msra.mxu0 %v848_v52 }
  0xf8   :  { %810 = vmatprep.subr.bf16.mxu0 %v858_v0 }
  0xfb   :  { %811 = vmatpush3.bf16.msra.mxu0 %v850_v54 }
  0xfc   :  { %805 = vmatmul.mubr.msk.bf16.vlgmr.msra.gmra.mrb[8].mxu1 %vm233_vm6, %v241_v50  ;;  %824 = vmatprep.subr.bf16.mxu0 %v858_v0 }
  0xfd   :  { %820 = vmatprep.mubr.msk.bf16.mxu1 %vm859_vm1, %v858_v0  ;;  %817 = vmatpush3.bf16.msra.mxu1 %v849_v53 }
  0xfe   :  { %818 = vmatprep.subr.bf16.mxu1 %v858_v0 }
 0x101   :  { %819 = vmatpush3.bf16.msra.mxu1 %v851_v55 }
 0x102   :  { %832 = vmatprep.subr.bf16.mxu1 %v858_v0 }
 0x1c7   :  { %v291_v57 = vpop.f32.mrb[4].mxu1  ;;  %v355_v58 = vpop.f32.mrb[8].mxu0 }
 0x1c8   :  { %v310_v59 = vrot.slane %v291_v57, 7  ;;  %v794_v60 = vpop.f32.mrb[5].mxu1  ;;  %v800_v61 = vpop.f32.mrb[9].mxu0 }
 0x1c9   :  { %v294_v62 = vpop.f32.mrb[6].mxu1  ;;  %v358_v63 = vpop.f32.mrb[10].mxu0 }
 0x1ca   :  { %v311_v1 = vsel %vm309_vm7, 0.0, %v310_v59  ;;  %v795_v2 = vpop.f32.mrb[7].mxu1  ;;  %v801_v3 = vpop.f32.mrb[11].mxu0 }
 0x1cb   :  { %v361_v4 = vadd.f32 %v355_v58, %v311_v1 }
 0x1cf   :  { %v402_v6 = vpop.f32.mrb[8].mxu1 }
 0x1d0   :  { %v408_v7 = vadd.f32 %v402_v6, %v361_v4  ;;  %v806_v8 = vpop.f32.mrb[9].mxu1 }
 0x1d1   :  { %v405_v9 = vpop.f32.mrb[10].mxu1 }
 0x1d2   :  { %v415_v10 = vadd.f32 %v734_v5, %v408_v7  ;;  %v807_v11 = vpop.f32.mrb[11].mxu1 }
 0x1d4   :  { %v416_v12 = vmax.f32 %v415_v10, 0.0 }
 0x1d6   :  { %418 = vst.msk [vmem:[#allocation3] sm:$0xff] %vm417_vm8, %v416_v12 }
 0x1dd   :  { %v427_v15 = vld [vmem:[#allocation3 + $0x1] ss:$4 sm:$0x3]  ;;  %v420_v16 = vld [vmem:[#allocation3] ss:$4 sm:$0x3] }
 0x1de   :  { %v428_v17 = vpack.c.bf16 %v427_v15, %v427_v15  ;;  %v421_v18 = vpack.c.bf16 %v420_v16, %v420_v16  ;;  %v544_v21 = vld [vmem:[#allocation3 + $0x2] ss:$4 sm:$0x3]  ;;  %v607_v22 = vld [vmem:[#allocation3 + $0x3] ss:$4 sm:$0x3] }
 0x1df   :  { %v545_v23 = vpack.c.bf16 %v544_v21, %v544_v21  ;;  %v608_v24 = vpack.c.bf16 %v607_v22, %v607_v22 }
 0x1e0   :  { %813 = vmatmul.mubr.msk.bf16.vlgmr.msra.gmra.mrb[12].mxu0 %vm417_vm8, %v428_v17  ;;  %821 = vmatmul.mubr.msk.bf16.vlgmr.msra.gmra.mrb[12].mxu1 %vm417_vm8, %v421_v18 }
 0x1e1   :  { %825 = vmatpush3.bf16.msra.mxu0 %v852_v13  ;;  %833 = vmatpush3.bf16.msra.mxu1 %v853_v14 }
 0x1e2   :  { %826 = vmatprep.subr.bf16.mxu0 %v858_v0  ;;  %834 = vmatprep.subr.bf16.mxu1 %v858_v0 }
 0x1e3   :  { %828 = vmatprep.mubr.msk.bf16.mxu0 %vm859_vm1, %v858_v0  ;;  %836 = vmatprep.mubr.msk.bf16.mxu1 %vm859_vm1, %v858_v0 }
 0x1e5   :  { %827 = vmatpush3.bf16.msra.mxu0 %v854_v19  ;;  %835 = vmatpush3.bf16.msra.mxu1 %v855_v20 }
 0x1e8   :  { %829 = vmatmul.mubr.msk.bf16.vlgmr.msra.gmra.mrb[16].mxu0 %vm417_vm8, %v545_v23  ;;  %837 = vmatmul.mubr.msk.bf16.vlgmr.msra.gmra.mrb[16].mxu1 %vm417_vm8, %v608_v24 }
 0x2b3   :  { %v482_v25 = vpop.f32.mrb[12].mxu0  ;;  %v537_v26 = vpop.f32.mrb[12].mxu1 }
 0x2b4   :  { %v538_v27 = vadd.f32 %v537_v26, %v482_v25  ;;  %v814_v28 = vpop.f32.mrb[13].mxu0  ;;  %v822_v29 = vpop.f32.mrb[13].mxu1 }
 0x2b5   :  { %v485_v30 = vpop.f32.mrb[14].mxu0  ;;  %v540_v31 = vpop.f32.mrb[14].mxu1 }
 0x2b6   :  { %v815_v32 = vpop.f32.mrb[15].mxu0  ;;  %v823_v33 = vpop.f32.mrb[15].mxu1 }
 0x2bb   :  { %v599_v0 = vpop.f32.mrb[16].mxu0  ;;  %v662_v34 = vpop.f32.mrb[16].mxu1 }
 0x2bc   :  { %v605_v35 = vadd.f32 %v599_v0, %v538_v27  ;;  %v830_v36 = vpop.f32.mrb[17].mxu0  ;;  %v838_v37 = vpop.f32.mrb[17].mxu1 }
 0x2bd   :  { %v602_v39 = vpop.f32.mrb[18].mxu0  ;;  %v665_v40 = vpop.f32.mrb[18].mxu1 }
 0x2be   :  { %v668_v41 = vadd.f32 %v662_v34, %v605_v35  ;;  %v831_v42 = vpop.f32.mrb[19].mxu0  ;;  %v839_v43 = vpop.f32.mrb[19].mxu1 }
 0x2c0   :  { %v675_v44 = vadd.f32 %v747_v38, %v668_v41 }
 0x2c2   :  { %v691_v45 = vmul.f32 %v675_v44, %v675_v44  ;;  %708 = vst [vmem:[%s1043_s8] sm:$0x3] %v675_v44  ;;  %v676_v47 = vmul.f32 0.5, %v675_v44  ;;  %v690_v50 = vadd.f32 1.0, %v675_v44 }
 0x2c4   :  { %693 = vrot.lane.b32.xlu0 %v691_v45, %s860_s19  ;;  %v677_v48 = vmul.f32 1.442695, %v676_v47 }
 0x2c6   :  { %856 = vpow2.f32 %v677_v48 }
 0x2c8   :  { %681 = vrot.lane.b32.xlu0 %v679_v46, %s860_s19 }
 0x2d0   :  { %v857_v49 = vpop.eup %856 }
 0x2d1   :  { %v697_v53 = vmul.f32 %v857_v49, %v857_v49 }
 0x336   :  { %v694_v51 = vpop.permute.xlu0 %693 }
 0x337   :  { %v696_v52 = vsub.f32 %v690_v50, %v694_v51 }
 0x339   :  { %v698_v54 = vsub.f32 %v696_v52, %v697_v53 }
 0x33a   :  { %v682_v55 = vpop.permute.xlu0 %681 }
 0x33b   :  { %700 = vrot.lane.b32.xlu1 %v698_v54, %s861_s6  ;;  %v684_v56 = vmul.f32 %v857_v49, %v682_v55 }
 0x33f   :  { %686 = vrot.lane.b32.xlu1 %v684_v56, %s861_s6 }
 0x3ad   :  { %v701_v57 = vpop.permute.xlu1 %700 }
 0x3ae   :  { %v704_v58 = vsel %vm703_vm9, %v701_v57, 0.0 }
 0x3af   :  { %705 = vadd.xlane.f32.xlu0 %v704_v58 }
 0x3b1   :  { %v687_v59 = vpop.permute.xlu1 %686 }
 0x3b2   :  { %v689_v60 = vadd.f32 %v687_v59, %v675_v44 }
 0x3b4   :  { %710 = vrot.lane.b32.xlu1 %v689_v60, %s862_s7 }
 0x426   :  { %v711_v61 = vpop.permute.xlu1 %710 }
 0x427   :  { %714 = vst.msk [vmem:[%s1043_s8] sm:$0x3] %vm713_vm10, %v711_v61 }
 0x43c   :  { %v706_v62 = vpop.xlane.xlu0 %705 }
 0x43d   :  { %v707_v63 = vmul.f32 -0.5, %v706_v62 }
 0x43f   :  { %716 = vst.msk [vmem:[%s1043_s8] sm:$0x3] %vm715_vm11, %v707_v63 }

</bundles_post_ra>
